<compile_context>
chip_gen: v5e
topology: v5e:2x2
jax: 0.10.0
libtpu: 0.0.40
codegen_flags: <defaults>
</compile_context>

<pallas_src>
import functools

import numpy as np
import jax
import jax.numpy as jnp
from jax import lax
from jax.experimental import pallas as pl
from jax.experimental.pallas import tpu as pltpu


def _nnmars_kernel(xt_ref, a_ref, b1_ref, w2_ref, b2_ref, o_ref, *,
                   chunk, num_chunks, use_vpu):
    # xt_ref : (d, tile_n)      X tile (f32 or bf16), batch along lanes
    # a_ref  : (nb_nodes, d)    frozen +-1 hinge matrix (f32)
    # b1_ref : (nb_nodes, 1)    input_layer.bias (column)
    # w2_ref : (nb_nodes, 1)    output_layer.weight (column)
    # b2_ref : (1, 1)           output_layer.bias
    # o_ref  : (1, tile_n)      sigmoid(logits), lane-dense
    d = xt_ref.shape[0]
    a = a_ref[...]
    b1 = b1_ref[...]
    w2 = w2_ref[...]
    b2 = b2_ref[...]

    def compute_chunk(start):
        x = xt_ref[:, pl.ds(start, chunk)].astype(jnp.float32)       # (d, chunk)
        if use_vpu:
            # A is a tiny +-1 selection matrix: an MXU matmul would be almost
            # entirely padding, so do d unrolled VPU rank-1 updates instead.
            h = a[:, 0:1] * x[0:1, :]                                 # (nb_nodes, chunk)
            for k in range(1, d):
                h = h + a[:, k:k + 1] * x[k:k + 1, :]
        else:
            # Only when nb_nodes * d fills the systolic tile reasonably.
            h = jnp.dot(a, x, preferred_element_type=jnp.float32)
        h = jnp.maximum(h + b1, 0.0)                                  # bias bcast + ReLU
        # Width-1 output contraction: VPU multiply + XLU sublane reduction
        # (avoids a 1-lane-wide MXU op).
        logit = jnp.sum(h * w2, axis=0, keepdims=True) + b2           # (1, chunk)
        # Sigmoid rides the EUP slot; full-lane (unmasked) stores.
        o_ref[:, pl.ds(start, chunk)] = jax.nn.sigmoid(logit)

    if num_chunks == 1:
        compute_chunk(0)
    else:
        # Chunked inner loop bounds the (nb_nodes, chunk) working set and its
        # temporaries' live ranges, independent of the (possibly 64K-lane) DMA
        # tile size.
        def body(c, carry):
            compute_chunk(pl.multiple_of(c * chunk, chunk))
            return carry
        lax.fori_loop(0, num_chunks, body, 0)


def nnmars_forward_feature_major(x_t, a, b1, w2, b2, *,
                                 max_tile_n=65536, chunk_n=4096):
    """NN-MARS forward on feature-major X.

    x_t : (d, N)  features-major (batch on the trailing/lane axis), f32 or bf16.
          Producing X in this layout upstream avoids any transpose HBM pass.
    a   : (nb_nodes, d) frozen +-1 hinge matrix
    b1  : (nb_nodes,)   input_layer.bias
    w2  : (1, nb_nodes) output_layer.weight
    b2  : (1,)          output_layer.bias
    Returns predictions of shape (N, 1), matching the PyTorch module.
    """
    x_t = jnp.asarray(x_t)
    if x_t.dtype != jnp.bfloat16:
        x_t = x_t.astype(jnp.float32)
    d, n = x_t.shape
    nb_nodes = a.shape[0]
    assert a.shape == (nb_nodes, d)
    assert max_tile_n % chunk_n == 0 and chunk_n % 128 == 0

    # --- Adaptive tile selection (perf review) ---------------------------------
    # Target ~N/4 lanes per grid step so there are >= ~4 steps (keeps v7x's two
    # TensorCores busy via the "parallel" axis), round up to a 128-lane multiple
    # (and to a chunk multiple once above chunk_n), and cap at max_tile_n=64K so
    # double-buffered X/out DMAs (~2.5 MiB at the cap) plus the chunk-bounded
    # intermediates stay well under v5e's 16 MiB scoped-VMEM default.
    tile = max(1, pl.cdiv(n, 4))
    tile = ((tile + 127) // 128) * 128
    if tile > chunk_n:
        tile = ((tile + chunk_n - 1) // chunk_n) * chunk_n
    tile_n = min(tile, max_tile_n)
    num_tiles = pl.cdiv(n, tile_n)
    chunk = min(chunk_n, tile_n)
    num_chunks = tile_n // chunk
    assert tile_n % chunk == 0

    # VPU rank-1 path unless BOTH dims make the MXU tile reasonably filled.
    use_vpu = (d <= 16) or (nb_nodes < 64)

    a_f = jnp.asarray(a, jnp.float32)                      # (nb_nodes, d)
    b1_c = jnp.asarray(b1, jnp.float32).reshape(nb_nodes, 1)
    w2_c = jnp.asarray(w2, jnp.float32).reshape(nb_nodes, 1)
    b2_c = jnp.asarray(b2, jnp.float32).reshape(1, 1)

    kernel = functools.partial(_nnmars_kernel, chunk=chunk,
                               num_chunks=num_chunks, use_vpu=use_vpu)

    # Advisory cost estimate: this kernel is HBM-bound; letting XLA know helps
    # it overlap the X producer / consumers around it.
    bytes_accessed = int(x_t.size * x_t.dtype.itemsize        # X read
                         + n * 4                              # output write
                         + a_f.size * 4 + nb_nodes * 8 + 4)   # params
    cost = pl.CostEstimate(
        flops=int(n * (2 * d * nb_nodes + 4 * nb_nodes + 4)),
        transcendentals=int(n),
        bytes_accessed=bytes_accessed,
    )

    out = pl.pallas_call(
        kernel,
        out_shape=jax.ShapeDtypeStruct((1, n), jnp.float32),
        grid=(num_tiles,),
        in_specs=[
            # X tiles stream through (double-buffered by the BlockSpec pipeline).
            pl.BlockSpec((d, tile_n), lambda i: (0, i)),
            # Small parameters stay VMEM-resident (constant block index).
            pl.BlockSpec((nb_nodes, d), lambda i: (0, 0)),
            pl.BlockSpec((nb_nodes, 1), lambda i: (0, 0)),
            pl.BlockSpec((nb_nodes, 1), lambda i: (0, 0)),
            pl.BlockSpec((1, 1), lambda i: (0, 0)),
        ],
        out_specs=pl.BlockSpec((1, tile_n), lambda i: (0, i)),
        compiler_params=pltpu.CompilerParams(
            # Batch tiles are independent -> shard across v7x's 2 TensorCores;
            # harmless on single-TC v5e/v6e.
            dimension_semantics=("parallel",),
        ),
        cost_estimate=cost,
    )(x_t, a_f, b1_c, w2_c, b2_c)

    # (1, N) -> (N, 1); element order preserved, no data movement.
    return out.reshape(n, 1)


def nnmars_forward(x, a, b1, w2, b2, **kwargs):
    """Drop-in (N, d) row-major wrapper matching the PyTorch module's call shape.

    NOTE: the x.T here is an extra HBM pass over X; produce X feature-major
    (d, N) upstream and call nnmars_forward_feature_major directly to avoid it.
    """
    x = jnp.asarray(x)
    return nnmars_forward_feature_major(x.T, a, b1, w2, b2, **kwargs)


def build_mars_input_weight(is_binary_feature):
    """Replicates the frozen +-1 hinge matrix built in NeuralNetwork_MARS.forward."""
    d = len(is_binary_feature)
    nb_nodes = sum(1 if b else 2 for b in is_binary_feature)
    a = np.zeros((nb_nodes, d), dtype=np.float32)
    j = 0
    for i, binary in enumerate(is_binary_feature):
        if not binary:
            a[j, i] = -1.0
            a[j + 1, i] = 1.0
            j += 2
        else:
            a[j, i] = 1.0
            j += 1
    return a, nb_nodes


if __name__ == "__main__":
    D = 4
    is_binary = [False, True, False, True]          # -> nb_nodes = 6
    a_np, nb_nodes = build_mars_input_weight(is_binary)
    a_j = jnp.asarray(a_np)

    key = jax.random.PRNGKey(0)
    kx, kb1, kw2, kb2 = jax.random.split(key, 4)

    # Deterministic "trained" parameters (nn.Linear-style small uniforms).
    b1 = jax.random.uniform(kb1, (nb_nodes,), jnp.float32, -0.5, 0.5)   # input_layer.bias
    w2 = jax.random.uniform(kw2, (1, nb_nodes), jnp.float32, -0.5, 0.5)  # output_layer.weight
    b2 = jax.random.uniform(kb2, (1,), jnp.float32, -0.5, 0.5)           # output_layer.bias

    mask = jnp.asarray([1.0 if b else 0.0 for b in is_binary], jnp.float32)

    def make_x(n, k):
        xc = jax.random.normal(k, (n, D), dtype=jnp.float32)
        xb = (xc > 0).astype(jnp.float32)
        # Binary columns take values {0,1}; continuous columns stay real-valued.
        return xc * (1.0 - mask) + xb * mask

    def ref_forward(x):
        h = jnp.maximum(x @ a_j.T + b1, 0.0)
        return jax.nn.sigmoid(h @ w2.T + b2)

    # Case 1: N=1000 (not a multiple of the tile) — exercises the ragged last
    # tile with no wrapper-side padding, f32 X stream.
    x1 = make_x(1000, kx)
    p1 = jax.block_until_ready(nnmars_forward(x1, a_j, b1, w2, b2))
    np.testing.assert_allclose(np.asarray(p1), np.asarray(ref_forward(x1)),
                               rtol=1e-5, atol=1e-5)
    assert p1.shape == (1000, 1)

    # Case 2: N=20000, feature-major input + bf16 X stream — exercises the
    # chunked inner loop (tile 8192, two 4096-lane chunks), multiple grid
    # steps, and the halved-HBM-traffic path.  Math stays f32 in-kernel.
    x2 = make_x(20000, jax.random.PRNGKey(1))
    x2_t_bf16 = x2.T.astype(jnp.bfloat16)                 # produce feature-major upstream
    p2 = nnmars_forward_feature_major(x2_t_bf16, a_j, b1, w2, b2)
    p2 = jax.block_until_ready(p2)
    np.testing.assert_allclose(np.asarray(p2), np.asarray(ref_forward(x2)),
                               rtol=0, atol=2e-2)
    assert p2.shape == (20000, 1)

    print("KERNEL_OK")
</pallas_src>

<mosaic_0001>
module attributes {stable_mosaic.version = 11 : i64} {
  func.func @_nnmars_kernel(%arg0: i32, %arg1: memref<4x256xf32, #tpu.memory_space<vmem>>, %arg2: memref<6x4xf32, #tpu.memory_space<vmem>>, %arg3: memref<6x1xf32, #tpu.memory_space<vmem>>, %arg4: memref<6x1xf32, #tpu.memory_space<vmem>>, %arg5: memref<1x1xf32, #tpu.memory_space<vmem>>, %arg6: memref<1x256xf32, #tpu.memory_space<vmem>>) attributes {dimension_semantics = [#tpu.dimension_semantics<parallel>], iteration_bounds = array<i64: 4>, scalar_prefetch = 0 : i64, scratch_operands = 0 : i64, tpu.core_type = #tpu.core_type<tc>, window_params = [{transform_indices = @transform_0, window_bounds = array<i64: 4, 256>}, {pipeline_mode = #tpu.pipeline_mode<synchronous>, transform_indices = @transform_1, window_bounds = array<i64: 6, 4>}, {pipeline_mode = #tpu.pipeline_mode<synchronous>, transform_indices = @transform_2, window_bounds = array<i64: 6, 1>}, {pipeline_mode = #tpu.pipeline_mode<synchronous>, transform_indices = @transform_3, window_bounds = array<i64: 6, 1>}, {pipeline_mode = #tpu.pipeline_mode<synchronous>, transform_indices = @transform_4, window_bounds = array<i64: 1, 1>}, {transform_indices = @transform_5, window_bounds = array<i64: 1, 256>}]} {
    %c0 = arith.constant 0 : index
    %c0_0 = arith.constant 0 : index
    %0 = vector.load %arg2[%c0, %c0_0] : memref<6x4xf32, #tpu.memory_space<vmem>>, vector<6x4xf32>
    %c0_1 = arith.constant 0 : index
    %c0_2 = arith.constant 0 : index
    %1 = vector.load %arg3[%c0_1, %c0_2] : memref<6x1xf32, #tpu.memory_space<vmem>>, vector<6x1xf32>
    %c0_3 = arith.constant 0 : index
    %c0_4 = arith.constant 0 : index
    %2 = vector.load %arg4[%c0_3, %c0_4] : memref<6x1xf32, #tpu.memory_space<vmem>>, vector<6x1xf32>
    %c0_5 = arith.constant 0 : index
    %c0_6 = arith.constant 0 : index
    %3 = vector.load %arg5[%c0_5, %c0_6] : memref<1x1xf32, #tpu.memory_space<vmem>>, vector<1x1xf32>
    %c0_7 = arith.constant 0 : index
    %c0_8 = arith.constant 0 : index
    %4 = vector.load %arg1[%c0_7, %c0_8] : memref<4x256xf32, #tpu.memory_space<vmem>>, vector<4x256xf32>
    %5 = vector.extract_strided_slice %0 {offsets = [0, 0], sizes = [6, 1], strides = [1, 1]} : vector<6x4xf32> to vector<6x1xf32>
    %6 = vector.extract_strided_slice %4 {offsets = [0, 0], sizes = [1, 256], strides = [1, 1]} : vector<4x256xf32> to vector<1x256xf32>
    %7 = vector.broadcast %5 : vector<6x1xf32> to vector<6x256xf32>
    %8 = vector.broadcast %6 : vector<1x256xf32> to vector<6x256xf32>
    %9 = arith.mulf %7, %8 : vector<6x256xf32>
    %10 = vector.extract_strided_slice %0 {offsets = [0, 1], sizes = [6, 1], strides = [1, 1]} : vector<6x4xf32> to vector<6x1xf32>
    %11 = vector.extract_strided_slice %4 {offsets = [1, 0], sizes = [1, 256], strides = [1, 1]} : vector<4x256xf32> to vector<1x256xf32>
    %12 = vector.broadcast %10 : vector<6x1xf32> to vector<6x256xf32>
    %13 = vector.broadcast %11 : vector<1x256xf32> to vector<6x256xf32>
    %14 = arith.mulf %12, %13 : vector<6x256xf32>
    %15 = arith.addf %9, %14 : vector<6x256xf32>
    %16 = vector.extract_strided_slice %0 {offsets = [0, 2], sizes = [6, 1], strides = [1, 1]} : vector<6x4xf32> to vector<6x1xf32>
    %17 = vector.extract_strided_slice %4 {offsets = [2, 0], sizes = [1, 256], strides = [1, 1]} : vector<4x256xf32> to vector<1x256xf32>
    %18 = vector.broadcast %16 : vector<6x1xf32> to vector<6x256xf32>
    %19 = vector.broadcast %17 : vector<1x256xf32> to vector<6x256xf32>
    %20 = arith.mulf %18, %19 : vector<6x256xf32>
    %21 = arith.addf %15, %20 : vector<6x256xf32>
    %22 = vector.extract_strided_slice %0 {offsets = [0, 3], sizes = [6, 1], strides = [1, 1]} : vector<6x4xf32> to vector<6x1xf32>
    %23 = vector.extract_strided_slice %4 {offsets = [3, 0], sizes = [1, 256], strides = [1, 1]} : vector<4x256xf32> to vector<1x256xf32>
    %24 = vector.broadcast %22 : vector<6x1xf32> to vector<6x256xf32>
    %25 = vector.broadcast %23 : vector<1x256xf32> to vector<6x256xf32>
    %26 = arith.mulf %24, %25 : vector<6x256xf32>
    %27 = arith.addf %21, %26 : vector<6x256xf32>
    %28 = vector.broadcast %1 : vector<6x1xf32> to vector<6x256xf32>
    %29 = arith.addf %27, %28 : vector<6x256xf32>
    %cst = arith.constant 0.000000e+00 : f32
    %30 = vector.broadcast %cst : f32 to vector<6x256xf32>
    %31 = arith.maximumf %29, %30 : vector<6x256xf32>
    %32 = vector.broadcast %2 : vector<6x1xf32> to vector<6x256xf32>
    %33 = arith.mulf %31, %32 : vector<6x256xf32>
    %cst_9 = arith.constant dense<0.000000e+00> : vector<256xf32>
    %34 = vector.multi_reduction <add>, %33, %cst_9 [0] : vector<6x256xf32> to vector<256xf32>
    %35 = vector.shape_cast %34 : vector<256xf32> to vector<1x256xf32>
    %36 = vector.broadcast %3 : vector<1x1xf32> to vector<1x256xf32>
    %37 = arith.addf %35, %36 : vector<1x256xf32>
    %38 = arith.negf %37 : vector<1x256xf32>
    %39 = math.exp %38 : vector<1x256xf32>
    %cst_10 = arith.constant 1.000000e+00 : f32
    %40 = vector.broadcast %cst_10 : f32 to vector<1x256xf32>
    %41 = arith.addf %40, %39 : vector<1x256xf32>
    %42 = arith.divf %40, %41 : vector<1x256xf32>
    %c0_11 = arith.constant 0 : index
    %c0_12 = arith.constant 0 : index
    %43 = vector.load %arg6[%c0_11, %c0_12] : memref<1x256xf32, #tpu.memory_space<vmem>>, vector<1x256xf32>
    tpu.vector_store %arg6[%c0_11, %c0_12], %42 {strides = array<i32>} : memref<1x256xf32, #tpu.memory_space<vmem>>, vector<1x256xf32>,
    return
  }
  func.func @transform_0(%arg0: i32) -> (i32, i32) {
    %c0_i32 = arith.constant 0 : i32
    %c0_i32_0 = arith.constant 0 : i32
    return %c0_i32, %arg0 : i32, i32
  }
  func.func @transform_1(%arg0: i32) -> (i32, i32) {
    %c0_i32 = arith.constant 0 : i32
    %c0_i32_0 = arith.constant 0 : i32
    %c0_i32_1 = arith.constant 0 : i32
    return %c0_i32, %c0_i32_0 : i32, i32
  }
  func.func @transform_2(%arg0: i32) -> (i32, i32) {
    %c0_i32 = arith.constant 0 : i32
    %c0_i32_0 = arith.constant 0 : i32
    %c0_i32_1 = arith.constant 0 : i32
    return %c0_i32, %c0_i32_0 : i32, i32
  }
  func.func @transform_3(%arg0: i32) -> (i32, i32) {
    %c0_i32 = arith.constant 0 : i32
    %c0_i32_0 = arith.constant 0 : i32
    %c0_i32_1 = arith.constant 0 : i32
    return %c0_i32, %c0_i32_0 : i32, i32
  }
  func.func @transform_4(%arg0: i32) -> (i32, i32) {
    %c0_i32 = arith.constant 0 : i32
    %c0_i32_0 = arith.constant 0 : i32
    %c0_i32_1 = arith.constant 0 : i32
    return %c0_i32, %c0_i32_0 : i32, i32
  }
  func.func @transform_5(%arg0: i32) -> (i32, i32) {
    %c0_i32 = arith.constant 0 : i32
    %c0_i32_0 = arith.constant 0 : i32
    return %c0_i32, %arg0 : i32, i32
  }
}

</mosaic_0001>

<bundles_post_ra>
// kernel: tpu_custom_call.1
= control target key start
LH: loop header
LB: loop body
LE: loop exit
PB: predicated region body
PF: predicated region fallthrough
CT: control target
= control target key end

     0   :  { %s839_s0 = inlined_call_operand.hbm [shape: f32[4,1000], index: 0, kind: input, shape index: {}]   ;;  %s840_s1 = inlined_call_operand.vmem [shape: f32[6,4], index: 1, kind: input, shape index: {}]   ;;  %s841_s2 = inlined_call_operand.vmem [shape: f32[6,1], index: 2, kind: input, shape index: {}]   ;;  %s842_s3 = inlined_call_operand.vmem [shape: f32[6,1], index: 3, kind: input, shape index: {}]   ;;  %s843_s4 = inlined_call_operand.<no memory space> [shape: f32[1,1], index: 4, kind: input, shape index: {}]   ;;  %s844_s5 = inlined_call_operand.hbm [shape: f32[1,1000], index: 5, kind: output, shape index: {}]  }
   0x1   :  { %v10_v0 = vstv %s843_s4 }
   0x2   :  { %11 = vst [vmem:[#allocation2] sm:$0x1] %v10_v0 }
   0x3   :  { %12 = vsyncpa [#allocation4], 0 }
   0x4   :  { %14 = vsyncpa [#allocation4 + $0x1], 0 }
   0x5   :  { %15 = vsyncpa [#allocation5], 0 }
   0x6   :  { %17 = vsyncpa [#allocation5 + $0x1], 0  ;;  %s698_s20 = smov 0   ;;  %s700_s21 = smov 0  }
   0x7   :  { %s702_s22 = smov 0   ;;  %s704_s23 = smov 0  }
   0x8 LB: > { %s719_s4 = sadd.s32 4294967295, %s659_s23   ;;  %s482_s24 = sadd.s32 4294967294, %s659_s23   ;;  %s659_s23 = sphi %s704_s23, %s855_s23   ;;  %s655_s22 = sphi %s702_s22, %s854_s22   ;;  %s651_s21 = sphi %s700_s21, %s853_s21   ;;  %s647_s20 = sphi %s698_s20, %s852_s20  }
   0x9   : > { %s723_s25 = sadd.s32 1, %s659_s23   ;;  %s30_s26 = sadd.s32 1, %s655_s22 }
   0xa   : > { %s27_s27 = ssub.s32 %s659_s23, %s723_s25  ;;  %p37_p0 = scmp.ne.s32.totalorder %s655_s22, %s651_s21 }
   0xb   : > { %p28_p1 = scmp.eq.s32.totalorder %s27_s27, 0  ;;  %p38_p2 = scmp.eq.s32.totalorder %s659_s23, 0 }
   0xc   : > { %p43_p3 = scmp.ne.s32.totalorder %s651_s21, %s647_s20  ;;  %p44_p4 = scmp.eq.s32.totalorder %s719_s4, 0 }
   0xd   : > { %s735_s28 = scalar_select %p28_p1, %s655_s22, %s30_s26  }
   0xe   : > { %p737_p5 = por %p38_p2, %p37_p0  ;;  %p741_p6 = por %p44_p4, %p43_p3 }
   0xf   : > { %p151_p7 = scmp.eq.s32.totalorder %s719_s4, 3  ;;  %p157_p8 = scmp.eq.s32.totalorder %s482_s24, 3 }
  0x10   : > { %p510_p9 = scmp.lt.s32.totalorder %s659_s23, 4  ;;  %s189_s8 = sand.u32 1, %s655_s22  }
  0x11   : > { %p747_p10 = por %p151_p7, %p37_p0  ;;  %p751_p11 = por %p157_p8, %p43_p3 }
  0x12   : > { %s497_s9 = sshll.u32 %s659_s23, 3  ;;  %s485_s10 = sshll.u32 %s189_s8, 3 }
  0x13   : > { %s198_s13 = scalar_lea.hbm %s839_s0, %s497_s9  ;;  %s193_s15 = scalar_lea.vmem [#allocation3], %s485_s10 }
  0x14   : > { %s200_s14 = sshll.u32 %s198_s13, 4  ;;  %s202_s16 = sshll.u32 %s193_s15, 4  ;;  %s201_s14 = int_to_ptr.hbm [resolvable:$true] %s200_s14  ;;  %s203_s16 = int_to_ptr.vmem [resolvable:$true] %s202_s16 }
  0x15   : > { %p762_p12 = pnand %p510_p9, %p737_p5  ;;  %p488_p13 = scmp.ge.s32.totalorder %s659_s23, 1 }
  0x16   : > { %p207_p0 = scmp.lt.s32.totalorder %s659_s23, 5  ;;  %s190_s18 = scalar_lea.sflag [#allocation4], %s189_s8 }
  0x17   : > { %s563_s19 = sshra.s32 %s201_s14, 4  ;;  %p567_p2 = pneg %p762_p12  ;;  %s564_s19 = int_to_ptr.hbm [resolvable:$true] %s563_s19 }
  0x18   : > { %s565_s24 = scalar_lea.hbm %s564_s19, 8  ;;  %s570_s29 = scalar_lea.hbm %s839_s0, 32 }
  0x19   : > { %p566_p1 = scmp.ne.s32.totalorder %s564_s19, %s565_s24  ;;  %p571_p5 = scmp.lt.s32.totalorder %s564_s19, %s839_s0 }
  0x1a   : > { %p572_p7 = scmp.lt.s32.totalorder %s570_s29, %s565_s24 }
  0x1b   : > { %p568_p3 = pnand %p567_p2, %p566_p1 }
  0x1c   : > { %p573_p8 = por %p572_p7, %p571_p5 }
  0x1d   : > { %p569_p4 = pneg %p568_p3 }
  0x1f   : > { %p574_p9 = pnand %p573_p8, %p569_p4 }
  0x21   : > { %577 = shalt.err (!%p574_p9)
}
  0x22   : > { %505 = dma.hbm_to_vmem [thread:$0]  (!%p762_p12), %s201_s14, 128, %s203_s16, %s190_s18  }
  0x23   : > { %p208_p1 = pnand %p488_p13, %p207_p0 }
  0x24   : > { %s783_s8 = sand.u32 (!%p208_p1), 1, %s651_s21  }
  0x25   : > { %211 = sbr.rel (%p208_p1) target bundleno = 233 (0xe9), region = 40  ;;  %s489_s11 = sshll.u32 (!%p208_p1), %s783_s8, 3 }
  0x26   : > { %s214_s12 = scalar_lea.sflag (!%p208_p1), [#allocation4], %s783_s8  ;;  %s217_s13 = scalar_lea.vmem (!%p208_p1), [#allocation3], %s489_s11 }
  0x2a   : > { %638 = dma.done.wait (%p741_p6), %s214_s12, 128  }
  0x2b   : > { %640 = vsyncadd (%p741_p6), %s214_s12, 4294967168  ;;  %v661_v1 = vmov 0   ;;  %v662_v2 = vmov 2   ;;  %v247_v3 = vld [vmem:[%s840_s1] sm:$0x3f]  ;;  %v663_v6 = vmov 1  }
  0x2c   : > { %548 = vset.pattern.permute.xlu0 %v661_v1  ;;  %550 = vset.pattern.permute.xlu1 %v662_v2  ;;  %v248_v4 = vld [vmem:[%s841_s2] sm:$0x3f]  ;;  %v664_v7 = vmov 3   ;;  %vm324_vm0 = vcmask 1045504   ;;  %s490_s30 = sshll.u32 %s783_s8, 1  ;;  %s494_s24 = sshll.u32 %s719_s4, 1 }
  0x2d   : > { %552 = vset.pattern.permute.xlu2 %v661_v1  ;;  %254 = vperm.xlu0 %548, %v247_v3   ;;  %v249_v5 = vld [vmem:[%s842_s3] sm:$0x3f]  ;;  %s407_s29 = scalar_lea.hbm %s844_s5, %s494_s24  ;;  %s244_s4 = scalar_lea.vmem [#allocation6], %s490_s30  ;;  %vm388_vm8 = vcmask 1040384  }
  0x2e   : > { %281 = vperm.xlu1 %550, %v247_v3   ;;  %310 = vperm.xlu2 %552, %v248_v4   ;;  %v250_v8 = vld [vmem:[#allocation2] sm:$0x1]  ;;  %v251_v9 = vld [vmem:[%s217_s13] sm:$0xff]  ;;  %s409_s9 = sshll.u32 %s244_s4, 4  ;;  %s411_s10 = sshll.u32 %s407_s29, 4  ;;  %s410_s9 = int_to_ptr.vmem [resolvable:$true] %s409_s9  ;;  %s412_s10 = int_to_ptr.hbm [resolvable:$true] %s411_s10 }
  0x2f   : > { %v258_v12 = vperm.slane %v251_v9, 0  ;;  %v259_v13 = vperm.slane %v251_v9, 4  ;;  %v270_v14 = vperm.slane %v251_v9, 1  ;;  %v271_v15 = vperm.slane %v251_v9, 5  ;;  %s397_s11 = scalar_lea.sflag [#allocation5], %s783_s8  ;;  %s607_s12 = sshra.s32 %s412_s10, 4  ;;  %s608_s12 = int_to_ptr.hbm [resolvable:$true] %s607_s12 }
  0x30   : > { %v284_v16 = vperm.slane %v251_v9, 2  ;;  %v285_v17 = vperm.slane %v251_v9, 6  ;;  %v298_v18 = vperm.slane %v251_v9, 3  ;;  %v299_v19 = vperm.slane %v251_v9, 7  ;;  %s609_s13 = scalar_lea.hbm %s608_s12, 2  ;;  %s613_s16 = scalar_lea.hbm %s844_s5, 8 }
  0x31   : > { %v262_v20 = vperm.slane %v258_v12, 0  ;;  %v263_v21 = vperm.slane %v259_v13, 0  ;;  %v274_v22 = vperm.slane %v270_v14, 1  ;;  %v275_v23 = vperm.slane %v271_v15, 1  ;;  %p610_p6 = scmp.ne.s32.totalorder %s608_s12, %s609_s13  ;;  %p614_p0 = scmp.lt.s32.totalorder %s608_s12, %s844_s5 }
  0x32   : > { %v288_v24 = vperm.slane %v284_v16, 2  ;;  %v289_v25 = vperm.slane %v285_v17, 2  ;;  %v302_v26 = vperm.slane %v298_v18, 3  ;;  %v303_v27 = vperm.slane %v299_v19, 3  ;;  %p615_p2 = scmp.lt.s32.totalorder %s613_s16, %s609_s13 }
  0x33   : > { %p611_p12 = pnand %p610_p6, %p747_p10 }
  0x34   : > { %p616_p3 = por %p615_p2, %p614_p0 }
  0x35   : > { %549 = vset.pattern.permute.xlu0 %v663_v6  ;;  %p612_p13 = pneg %p611_p12 }
  0x36   : > { %551 = vset.pattern.permute.xlu1 %v664_v7  ;;  %267 = vperm.xlu0 %549, %v247_v3  }
  0x37   : > { %295 = vperm.xlu1 %551, %v247_v3   ;;  %319 = vperm.xlu2 %552, %v249_v5   ;;  %p617_p4 = pnand %p616_p3, %p612_p13 }
  0x3e   : > { %554 = vset.pattern.permute.xlu0 %v661_v1 }
  0x3f   : > { %553 = vset.pattern.permute.xlu1 %v661_v1 }
  0x40   : > { %341 = vperm.xlu1 %553, %v250_v8  }
  0x88   : > { %v311_v36 = vpop.permute.xlu2 %310 }
  0x91   : > { %v320_v49 = vpop.permute.xlu2 %319 }
  0x9f   : > { %v255_v10 = vpop.permute.xlu0 %254 }
  0xa0   : > { %v282_v11 = vpop.permute.xlu1 %281  ;;  %v264_v30 = vmul.f32 %v262_v20, %v255_v10  ;;  %v265_v31 = vmul.f32 %v263_v21, %v255_v10 }
  0xa1   : > { %v290_v34 = vmul.f32 %v288_v24, %v282_v11  ;;  %v291_v35 = vmul.f32 %v289_v25, %v282_v11 }
  0xa8   : > { %v268_v28 = vpop.permute.xlu0 %267 }
  0xa9   : > { %v296_v29 = vpop.permute.xlu1 %295  ;;  %v276_v32 = vmul.f32 %v274_v22, %v268_v28  ;;  %v277_v33 = vmul.f32 %v275_v23, %v268_v28 }
  0xaa   : > { %v304_v39 = vmul.f32 %v302_v26, %v296_v29  ;;  %v305_v40 = vmul.f32 %v303_v27, %v296_v29  ;;  %v391_v27 = vlaneseq }
  0xab   : > { %v278_v37 = vadd.f32 %v276_v32, %v264_v30  ;;  %v279_v38 = vadd.f32 %v277_v33, %v265_v31 }
  0xac   : > { %vm393_vm10 = vcmp.lt.s32.totalorder %v391_v27, 256 }
  0xad   : > { %v292_v41 = vadd.f32 %v290_v34, %v278_v37  ;;  %v293_v42 = vadd.f32 %v291_v35, %v279_v38 }
  0xaf   : > { %v306_v43 = vadd.f32 %v304_v39, %v292_v41  ;;  %v307_v44 = vadd.f32 %v305_v40, %v293_v42 }
  0xb1   : > { %v313_v45 = vadd.f32 %v311_v36, %v306_v43  ;;  %v314_v46 = vadd.f32 %v311_v36, %v307_v44 }
  0xb2   : > { %v342_v60 = vpop.permute.xlu1 %341 }
  0xb3   : > { %v315_v47 = vmax.f32 %v313_v45, 0.0  ;;  %v316_v48 = vmax.f32 %v314_v46, 0.0  ;;  %v344_v1 = vperm.slane %v342_v60, 0 }
  0xb5   : > { %v322_v50 = vmul.f32 %v320_v49, %v315_v47  ;;  %v323_v51 = vmul.f32 %v320_v49, %v316_v48 }
  0xb7   : > { %v325_v52 = vsel %vm324_vm0, %v322_v50, 0.0  ;;  %v332_v53 = vsel %vm324_vm0, %v323_v51, 0.0 }
  0xb8   : > { %v326_v54 = vrot.slane %v325_v52, 4  ;;  %v333_v55 = vrot.slane %v332_v53, 4 }
  0xba   : > { %v327_v56 = vadd.f32 %v326_v54, %v325_v52  ;;  %v334_v57 = vadd.f32 %v333_v55, %v332_v53 }
  0xbc   : > { %v328_v58 = vrot.slane %v327_v56, 2  ;;  %v335_v59 = vrot.slane %v334_v57, 2 }
  0xbe   : > { %v329_v61 = vadd.f32 %v328_v58, %v327_v56  ;;  %v336_v62 = vadd.f32 %v335_v59, %v334_v57 }
  0xc0   : > { %v330_v63 = vrot.slane %v329_v61, 1  ;;  %v337_v0 = vrot.slane %v336_v62, 1 }
  0xc2   : > { %v331_v2 = vadd.f32 %v330_v63, %v329_v61  ;;  %v338_v3 = vadd.f32 %v337_v0, %v336_v62 }
  0xc4   : > { %v345_v4 = vadd.f32 %v344_v1, %v331_v2  ;;  %v346_v5 = vadd.f32 %v344_v1, %v338_v3 }
  0xc6   : > { %v491_v6 = vmul.f32 -1.442695, %v345_v4  ;;  %v492_v7 = vmul.f32 -1.442695, %v346_v5 }
  0xc8   : > { %555 = vpow2.f32 %v491_v6 }
  0xc9   : > { %557 = vpow2.f32 %v492_v7 }
  0xce   : > { %v556_v8 = vpop.eup %555 }
  0xcf   : > { %v558_v9 = vpop.eup %557  ;;  %v353_v10 = vadd.f32 1.0, %v556_v8 }
  0xd0   : > { %v354_v11 = vadd.f32 1.0, %v558_v9 }
  0xd1   : > { %559 = vrcp.f32 %v353_v10  ;;  %vm360_vm3 = vweird.f32 %v353_v10  ;;  %v366_v23 = vand.u32 2147483648, %v353_v10  ;;  %v364_v25 = vand.u32 2147483647, %v353_v10 }
  0xd2   : > { %561 = vrcp.f32 %v354_v11  ;;  %v381_v19 = vand.u32 2147483648, %v354_v11  ;;  %v379_v21 = vand.u32 2147483647, %v354_v11  ;;  %vm375_vm4 = vweird.f32 %v354_v11 }
  0xd3   : > { %v367_v31 = vor.u32 1.1754944e-38, %v366_v23  ;;  %vm365_vm9 = vcmp.eq.f32.partialorder %v364_v25, 8.507059e+37 }
  0xd4   : > { %v382_v28 = vor.u32 1.1754944e-38, %v381_v19  ;;  %vm380_vm7 = vcmp.eq.f32.partialorder %v379_v21, 8.507059e+37 }
  0xd7   : > { %v560_v12 = vpop.eup %559 }
  0xd8   : > { %v562_v13 = vpop.eup %561  ;;  %v356_v14 = vmul.f32 %v560_v12, %v353_v10  ;;  %vm361_vm1 = vweird.f32 %v560_v12 }
  0xd9   : > { %v371_v15 = vmul.f32 %v562_v13, %v354_v11  ;;  %vm376_vm2 = vweird.f32 %v562_v13  ;;  %vm805_vm5 = vmor %vm360_vm3, %vm361_vm1 }
  0xda   : > { %v357_v16 = vsub.f32 1.0, %v356_v14  ;;  %vm377_vm6 = vmor %vm375_vm4, %vm376_vm2 }
  0xdb   : > { %v372_v17 = vsub.f32 1.0, %v371_v15 }
  0xdc   : > { %v358_v18 = vmul.f32 %v560_v12, %v357_v16 }
  0xdd   : > { %v373_v20 = vmul.f32 %v562_v13, %v372_v17 }
  0xde   : > { %v359_v22 = vadd.f32 %v560_v12, %v358_v18 }
  0xdf   : > { %v374_v26 = vadd.f32 %v562_v13, %v373_v20 }
  0xe0   : > { %v363_v29 = vsel %vm805_vm5, %v560_v12, %v359_v22 }
  0xe1   : > { %v378_v30 = vsel %vm377_vm6, %v562_v13, %v374_v26  ;;  %v368_v34 = vsel %vm365_vm9, %v367_v31, %v363_v29 }
  0xe2   : > { %v383_v32 = vsel %vm380_vm7, %v382_v28, %v378_v30 }
  0xe3   : > { %v387_v33 = vrot.slane %v383_v32, 7 }
  0xe5   : > { %v389_v35 = vsel %vm388_vm8, %v368_v34, %v387_v33 }
  0xe6   : > { %395 = vst.msk [vmem:[%s244_s4] sm:$0x3] %vm393_vm10, %v389_v35 }
  0xe7   : > { %620 = shalt.err (!%p617_p4)
}
  0xe8   : > { %500 = dma.vmem_to_hbm [thread:$0]  (%p747_p10), %s410_s9, 32, %s412_s10, %s397_s11  }
  0xe9 PF: > { %p511_p5 = scmp.ge.s32.totalorder %s659_s23, 2  ;;  %s423_s8 = sand.u32 1, %s647_s20  }
  0xea   : > { %s424_s19 = scalar_lea.sflag [#allocation5], %s423_s8 }
  0xeb   : > { %p507_p7 = pnand %p511_p5, %p751_p11 }
  0xed   : > { %p508_p8 = pneg %p507_p7 }
  0xef   : > { %642 = dma.done.wait (%p508_p8), %s424_s19, 32  }
  0xf0   : > { %644 = vsyncadd (%p508_p8), %s424_s19, 4294967264  ;;  %p20_p9 = scmp.ge.s32.totalorder %s723_s25, 6   ;;  %s852_s20 = smov %s651_s21 }
  0xf1   : > { %s853_s21 = smov %s655_s22  ;;  %s854_s22 = smov %s735_s28 }
  0xf2   : > { %s855_s23 = smov %s723_s25  ;;  %22 = sbr.rel (!%p20_p9) target bundleno = 8 (0x8), region = 85 }
  0xf7   :  { %430 = vsyncpa [#allocation4], 1 }
  0xf8   :  { %432 = vsyncpa [#allocation4 + $0x1], 1 }
  0xf9   :  { %433 = vsyncpa [#allocation5], 1 }
  0xfa   :  { %435 = vsyncpa [#allocation5 + $0x1], 1 }

</bundles_post_ra>
